<compile_context>
chip_gen: v6e
topology: v6e:2x2x1
jax: 0.10.0
libtpu: 0.0.40
codegen_flags: <defaults>
</compile_context>

<pallas_src>
import functools

import jax
import jax.numpy as jnp
from jax import lax
from jax.experimental import pallas as pl
from jax.experimental.pallas import tpu as pltpu

BN_EPS = 1e-5
LANE = 128
VMEM_LIMIT_BYTES = 48 * 1024 * 1024   # > default scoped limit everywhere, < 64 MiB v7x physical


def _round_up(x, m):
    return (x + m - 1) // m * m


def _pick_n_tile(n, c, h):
    """Pick the N (lane) tile: ~2 MiB of f32 per step; multiple of 128 when tiled."""
    bytes_per_col = 4 * (2 * c + h)                      # x + out + hidden, f32
    target = max(512, (2 << 20) // max(bytes_per_col, 1))
    target = min(_round_up(target, LANE), 8192)
    if n <= target:
        return n, n, 1                                   # single tile, no padding at all
    nt = -(-n // target)
    tn = _round_up(-(-n // nt), LANE)                    # balance tiles, bound padding
    return tn, tn * nt, nt


def _compute_z(x_ref, w1_ref, b1_ref, w2_ref):
    """z = x + W2 @ relu(W1 @ x + b1) for one [C, TN] channels-first tile."""
    x = x_ref[...]                                       # [C, TN] f32
    mm_dtype = w1_ref.dtype                              # weights pre-cast (bf16 default)
    hid = jnp.dot(w1_ref[...], x.astype(mm_dtype),
                  preferred_element_type=jnp.float32) + b1_ref[...]   # [H, TN] f32
    hid = jnp.maximum(hid, 0.0)
    y = jnp.dot(w2_ref[...], hid.astype(mm_dtype),
                preferred_element_type=jnp.float32)      # [C, TN] f32
    return x + y


def ff_stats_kernel(x_ref, w1_ref, b1_ref, w2_ref, sum_ref, sq_ref,
                    *, tn, n_real, mask_cols):
    """Phase 1: per-tile partial BatchNorm statistics (no z written to HBM)."""
    z = _compute_z(x_ref, w1_ref, b1_ref, w2_ref)        # [C, TN] f32
    if mask_cols:
        # Only traced when N was padded to a tile multiple; interior-aligned cases pay nothing.
        col = pl.program_id(1) * tn + lax.broadcasted_iota(jnp.int32, z.shape, 1)
        z = jnp.where(col < n_real, z, 0.0)
    sum_ref[...] = jnp.sum(z, axis=1, keepdims=True)[None, None]     # [1,1,C,1]
    sq_ref[...] = jnp.sum(z * z, axis=1, keepdims=True)[None, None]


def ff_apply_kernel(x_ref, w1_ref, b1_ref, w2_ref, scale_ref, shift_ref, out_ref):
    """Phase 2: recompute z from x and apply the fused BN FMA (out = z*scale + shift)."""
    z = _compute_z(x_ref, w1_ref, b1_ref, w2_ref)
    out_ref[...] = z * scale_ref[...] + shift_ref[...]


def ff_forward(x, w1, b1, w2, gamma, beta, *, matmul_dtype=jnp.bfloat16):
    """x: [b, dim_embed, N] (PyTorch Conv1d layout). Returns BN(x + FF(x)), same shape.

    w1: [hidden, dim_embed] (Conv1d weight, k=1 squeezed), b1: [hidden],
    w2: [dim_embed, hidden], gamma/beta: [dim_embed].
    """
    b, c, n = x.shape
    h = w1.shape[0]

    tn, n_pad, nt = _pick_n_tile(n, c, h)
    x_f32 = x.astype(jnp.float32)
    x_in = x_f32 if n_pad == n else jnp.pad(x_f32, ((0, 0), (0, 0), (0, n_pad - n)))

    # Pre-cast weights once (halves their HBM/VMEM footprint, no per-step VPU cast).
    w1m = w1.astype(matmul_dtype)
    w2m = w2.astype(matmul_dtype)
    b1c = b1.astype(jnp.float32).reshape(h, 1)
    gammac = gamma.astype(jnp.float32).reshape(c, 1)
    betac = beta.astype(jnp.float32).reshape(c, 1)

    x_spec = pl.BlockSpec((None, c, tn), lambda bi, j: (bi, 0, j))
    w1_spec = pl.BlockSpec((h, c), lambda bi, j: (0, 0))    # VMEM-resident weights
    b1_spec = pl.BlockSpec((h, 1), lambda bi, j: (0, 0))
    w2_spec = pl.BlockSpec((c, h), lambda bi, j: (0, 0))
    vec_spec = pl.BlockSpec((c, 1), lambda bi, j: (0, 0))
    stat_spec = pl.BlockSpec((1, 1, c, 1), lambda bi, j: (bi, j, 0, 0))

    grid = (b, nt)
    cparams = pltpu.CompilerParams(
        dimension_semantics=("parallel", "parallel"),        # megacore-shardable
        vmem_limit_bytes=VMEM_LIMIT_BYTES)

    mm_flops = 4 * b * n_pad * c * h
    w_bytes = (2 * c * h) * jnp.dtype(matmul_dtype).itemsize + 4 * (h + 2 * c)
    x_bytes = 4 * b * c * n_pad

    kern1 = functools.partial(ff_stats_kernel, tn=tn, n_real=n, mask_cols=(n_pad != n))
    zsum_p, zsq_p = pl.pallas_call(
        kern1,
        out_shape=(jax.ShapeDtypeStruct((b, nt, c, 1), jnp.float32),
                   jax.ShapeDtypeStruct((b, nt, c, 1), jnp.float32)),
        grid=grid,
        in_specs=[x_spec, w1_spec, b1_spec, w2_spec],
        out_specs=(stat_spec, stat_spec),
        compiler_params=cparams,
        cost_estimate=pl.CostEstimate(flops=mm_flops, transcendentals=0,
                                      bytes_accessed=x_bytes + w_bytes),
    )(x_in, w1m, b1c, w2m)

    # Finalize BN statistics (train mode: biased variance, eps=1e-5) -- tiny [C,1] math.
    m = b * n
    mean = jnp.sum(zsum_p, axis=(0, 1)) / m
    var = jnp.maximum(jnp.sum(zsq_p, axis=(0, 1)) / m - mean * mean, 0.0)
    # TODO(synk): E[z^2]-E[z]^2 can lose precision for badly-centered channels at huge M;
    # switch to shifted/Welford partial sums if that regime matters.
    inv = lax.rsqrt(var + BN_EPS)
    scale = gammac * inv
    shift = betac - mean * scale

    out_pad = pl.pallas_call(
        ff_apply_kernel,
        out_shape=jax.ShapeDtypeStruct((b, c, n_pad), jnp.float32),
        grid=grid,
        in_specs=[x_spec, w1_spec, b1_spec, w2_spec, vec_spec, vec_spec],
        out_specs=x_spec,
        compiler_params=cparams,
        cost_estimate=pl.CostEstimate(flops=mm_flops + 2 * b * n_pad * c,
                                      transcendentals=0,
                                      bytes_accessed=2 * x_bytes + w_bytes),
    )(x_in, w1m, b1c, w2m, scale, shift)

    return out_pad if n_pad == n else out_pad[:, :, :n]


def ff_reference(x, w1, b1, w2, gamma, beta, matmul_dtype=jnp.float32):
    """Pure-JAX reference matching the PyTorch module (training-mode BatchNorm1d)."""
    x = x.astype(jnp.float32)
    md = matmul_dtype
    hid = jnp.einsum('hc,bcn->bhn', w1.astype(md), x.astype(md),
                     preferred_element_type=jnp.float32) + b1[None, :, None]
    hid = jnp.maximum(hid, 0.0)
    y = jnp.einsum('ch,bhn->bcn', w2.astype(md), hid.astype(md),
                   preferred_element_type=jnp.float32)
    z = x + y
    mean = jnp.mean(z, axis=(0, 2), keepdims=True)
    var = jnp.mean((z - mean) ** 2, axis=(0, 2), keepdims=True)
    return (gamma[None, :, None] * (z - mean) * lax.rsqrt(var + BN_EPS)
            + beta[None, :, None])


def init_params(key, dim_embed, hidden_dim):
    """Deterministic synthetic params in PyTorch Conv1d/BatchNorm1d layout (k=1 squeezed)."""
    k1, k2, k3 = jax.random.split(key, 3)
    s1 = 1.0 / (dim_embed ** 0.5)
    w1 = jax.random.uniform(k1, (hidden_dim, dim_embed), jnp.float32, -s1, s1)
    b1 = jax.random.uniform(k2, (hidden_dim,), jnp.float32, -s1, s1)
    s2 = 1.0 / (hidden_dim ** 0.5)
    w2 = jax.random.uniform(k3, (dim_embed, hidden_dim), jnp.float32, -s2, s2)
    gamma = jnp.ones((dim_embed,), jnp.float32)
    beta = jnp.zeros((dim_embed,), jnp.float32)
    return w1, b1, w2, gamma, beta


if __name__ == "__main__":
    key = jax.random.PRNGKey(0)
    kx, kp = jax.random.split(key)

    # Small shapes; N=200 is deliberately not a multiple of 128 (single full-dim tile path).
    b, dim_embed, N, hidden_dim = 2, 16, 200, 32
    x = jax.random.normal(kx, (b, dim_embed, N), jnp.float32)   # [b, dim_embed, N]
    w1, b1, w2, gamma, beta = init_params(kp, dim_embed, hidden_dim)

    fwd = jax.jit(ff_forward)
    out = fwd(x, w1, b1, w2, gamma, beta)
    jax.block_until_ready(out)
    assert out.shape == (b, dim_embed, N)

    # Tight check against a reference that does the same bf16-MXU / f32-accumulate math.
    ref_bf16 = ff_reference(x, w1, b1, w2, gamma, beta, matmul_dtype=jnp.bfloat16)
    err_bf16 = float(jnp.max(jnp.abs(out - ref_bf16)))
    assert err_bf16 < 1e-3, f"mixed-precision reference mismatch: max abs err {err_bf16}"

    # Loose sanity check against the full-f32 reference (bf16 matmul rounding only).
    ref_f32 = ff_reference(x, w1, b1, w2, gamma, beta, matmul_dtype=jnp.float32)
    err_f32 = float(jnp.max(jnp.abs(out - ref_f32)))
    assert err_f32 < 5e-2, f"f32 reference mismatch: max abs err {err_f32}"

    print("KERNEL_OK")
</pallas_src>

<mosaic_0001>
module attributes {stable_mosaic.version = 11 : i64} {
  func.func @ff_stats_kernel(%arg0: i32, %arg1: i32, %arg2: memref<1x16x200xf32, #tpu.memory_space<vmem>>, %arg3: memref<32x16xbf16, #tpu.memory_space<vmem>>, %arg4: memref<32x1xf32, #tpu.memory_space<vmem>>, %arg5: memref<16x32xbf16, #tpu.memory_space<vmem>>, %arg6: memref<1x1x16x1xf32, #tpu.memory_space<vmem>>, %arg7: memref<1x1x16x1xf32, #tpu.memory_space<vmem>>) attributes {dimension_semantics = [#tpu.dimension_semantics<parallel>, #tpu.dimension_semantics<parallel>], iteration_bounds = array<i64: 2, 1>, scalar_prefetch = 0 : i64, scratch_operands = 0 : i64, tpu.core_type = #tpu.core_type<tc>, window_params = [{transform_indices = @transform_0, window_bounds = array<i64: 1, 16, 200>}, {pipeline_mode = #tpu.pipeline_mode<synchronous>, transform_indices = @transform_1, window_bounds = array<i64: 32, 16>}, {pipeline_mode = #tpu.pipeline_mode<synchronous>, transform_indices = @transform_2, window_bounds = array<i64: 32, 1>}, {pipeline_mode = #tpu.pipeline_mode<synchronous>, transform_indices = @transform_3, window_bounds = array<i64: 16, 32>}, {transform_indices = @transform_4, window_bounds = array<i64: 1, 1, 16, 1>}, {transform_indices = @transform_5, window_bounds = array<i64: 1, 1, 16, 1>}]} {
    %c0 = arith.constant 0 : index
    %c0_0 = arith.constant 0 : index
    %c0_1 = arith.constant 0 : index
    %0 = vector.load %arg2[%c0, %c0_0, %c0_1] : memref<1x16x200xf32, #tpu.memory_space<vmem>>, vector<1x16x200xf32>
    %1 = vector.shape_cast %0 : vector<1x16x200xf32> to vector<16x200xf32>
    %c0_2 = arith.constant 0 : index
    %c0_3 = arith.constant 0 : index
    %2 = vector.load %arg3[%c0_2, %c0_3] : memref<32x16xbf16, #tpu.memory_space<vmem>>, vector<32x16xbf16>
    %3 = arith.truncf %1 : vector<16x200xf32> to vector<16x200xbf16>
    %cst = arith.constant dense<0.000000e+00> : vector<32x200xf32>
    %4 = tpu.matmul %2, %3, %cst {dimension_numbers = #tpu.dot_dimension_numbers<[1], [0], [0], [1], [0, 0, 1, 1], [], []>} : vector<32x16xbf16>, vector<16x200xbf16>, vector<32x200xf32> -> vector<32x200xf32>
    %c0_4 = arith.constant 0 : index
    %c0_5 = arith.constant 0 : index
    %5 = vector.load %arg4[%c0_4, %c0_5] : memref<32x1xf32, #tpu.memory_space<vmem>>, vector<32x1xf32>
    %6 = vector.broadcast %5 : vector<32x1xf32> to vector<32x200xf32>
    %7 = arith.addf %4, %6 : vector<32x200xf32>
    %cst_6 = arith.constant 0.000000e+00 : f32
    %8 = vector.broadcast %cst_6 : f32 to vector<32x200xf32>
    %9 = arith.maximumf %7, %8 : vector<32x200xf32>
    %c0_7 = arith.constant 0 : index
    %c0_8 = arith.constant 0 : index
    %10 = vector.load %arg5[%c0_7, %c0_8] : memref<16x32xbf16, #tpu.memory_space<vmem>>, vector<16x32xbf16>
    %11 = arith.truncf %9 : vector<32x200xf32> to vector<32x200xbf16>
    %cst_9 = arith.constant dense<0.000000e+00> : vector<16x200xf32>
    %12 = tpu.matmul %10, %11, %cst_9 {dimension_numbers = #tpu.dot_dimension_numbers<[1], [0], [0], [1], [0, 0, 1, 1], [], []>} : vector<16x32xbf16>, vector<32x200xbf16>, vector<16x200xf32> -> vector<16x200xf32>
    %13 = arith.addf %1, %12 : vector<16x200xf32>
    %cst_10 = arith.constant dense<0.000000e+00> : vector<16xf32>
    %14 = vector.multi_reduction <add>, %13, %cst_10 [1] : vector<16x200xf32> to vector<16xf32>
    %15 = vector.shape_cast %14 : vector<16xf32> to vector<16x1xf32>
    %16 = vector.shape_cast %15 : vector<16x1xf32> to vector<1x1x16x1xf32>
    %c0_11 = arith.constant 0 : index
    %c0_12 = arith.constant 0 : index
    %c0_13 = arith.constant 0 : index
    %c0_14 = arith.constant 0 : index
    %17 = vector.load %arg6[%c0_11, %c0_12, %c0_13, %c0_14] : memref<1x1x16x1xf32, #tpu.memory_space<vmem>>, vector<1x1x16x1xf32>
    tpu.vector_store %arg6[%c0_11, %c0_12, %c0_13, %c0_14], %16 {strides = array<i32>} : memref<1x1x16x1xf32, #tpu.memory_space<vmem>>, vector<1x1x16x1xf32>,
    %18 = arith.mulf %13, %13 : vector<16x200xf32>
    %cst_15 = arith.constant dense<0.000000e+00> : vector<16xf32>
    %19 = vector.multi_reduction <add>, %18, %cst_15 [1] : vector<16x200xf32> to vector<16xf32>
    %20 = vector.shape_cast %19 : vector<16xf32> to vector<16x1xf32>
    %21 = vector.shape_cast %20 : vector<16x1xf32> to vector<1x1x16x1xf32>
    %c0_16 = arith.constant 0 : index
    %c0_17 = arith.constant 0 : index
    %c0_18 = arith.constant 0 : index
    %c0_19 = arith.constant 0 : index
    %22 = vector.load %arg7[%c0_16, %c0_17, %c0_18, %c0_19] : memref<1x1x16x1xf32, #tpu.memory_space<vmem>>, vector<1x1x16x1xf32>
    tpu.vector_store %arg7[%c0_16, %c0_17, %c0_18, %c0_19], %21 {strides = array<i32>} : memref<1x1x16x1xf32, #tpu.memory_space<vmem>>, vector<1x1x16x1xf32>,
    return
  }
  func.func @transform_0(%arg0: i32, %arg1: i32) -> (i32, i32, i32) {
    %c0_i32 = arith.constant 0 : i32
    %c0_i32_0 = arith.constant 0 : i32
    return %arg0, %c0_i32, %arg1 : i32, i32, i32
  }
  func.func @transform_1(%arg0: i32, %arg1: i32) -> (i32, i32) {
    %c0_i32 = arith.constant 0 : i32
    %c0_i32_0 = arith.constant 0 : i32
    %c0_i32_1 = arith.constant 0 : i32
    return %c0_i32, %c0_i32_0 : i32, i32
  }
  func.func @transform_2(%arg0: i32, %arg1: i32) -> (i32, i32) {
    %c0_i32 = arith.constant 0 : i32
    %c0_i32_0 = arith.constant 0 : i32
    %c0_i32_1 = arith.constant 0 : i32
    return %c0_i32, %c0_i32_0 : i32, i32
  }
  func.func @transform_3(%arg0: i32, %arg1: i32) -> (i32, i32) {
    %c0_i32 = arith.constant 0 : i32
    %c0_i32_0 = arith.constant 0 : i32
    %c0_i32_1 = arith.constant 0 : i32
    return %c0_i32, %c0_i32_0 : i32, i32
  }
  func.func @transform_4(%arg0: i32, %arg1: i32) -> (i32, i32, i32, i32) {
    %c0_i32 = arith.constant 0 : i32
    %c0_i32_0 = arith.constant 0 : i32
    %c0_i32_1 = arith.constant 0 : i32
    return %arg0, %arg1, %c0_i32, %c0_i32_0 : i32, i32, i32, i32
  }
  func.func @transform_5(%arg0: i32, %arg1: i32) -> (i32, i32, i32, i32) {
    %c0_i32 = arith.constant 0 : i32
    %c0_i32_0 = arith.constant 0 : i32
    %c0_i32_1 = arith.constant 0 : i32
    return %arg0, %arg1, %c0_i32, %c0_i32_0 : i32, i32, i32, i32
  }
}

module attributes {stable_mosaic.version = 11 : i64} {
  func.func @ff_apply_kernel(%arg0: i32, %arg1: i32, %arg2: memref<1x16x200xf32, #tpu.memory_space<vmem>>, %arg3: memref<32x16xbf16, #tpu.memory_space<vmem>>, %arg4: memref<32x1xf32, #tpu.memory_space<vmem>>, %arg5: memref<16x32xbf16, #tpu.memory_space<vmem>>, %arg6: memref<16x1xf32, #tpu.memory_space<vmem>>, %arg7: memref<16x1xf32, #tpu.memory_space<vmem>>, %arg8: memref<1x16x200xf32, #tpu.memory_space<vmem>>) attributes {dimension_semantics = [#tpu.dimension_semantics<parallel>, #tpu.dimension_semantics<parallel>], iteration_bounds = array<i64: 2, 1>, scalar_prefetch = 0 : i64, scratch_operands = 0 : i64, tpu.core_type = #tpu.core_type<tc>, window_params = [{transform_indices = @transform_0, window_bounds = array<i64: 1, 16, 200>}, {pipeline_mode = #tpu.pipeline_mode<synchronous>, transform_indices = @transform_1, window_bounds = array<i64: 32, 16>}, {pipeline_mode = #tpu.pipeline_mode<synchronous>, transform_indices = @transform_2, window_bounds = array<i64: 32, 1>}, {pipeline_mode = #tpu.pipeline_mode<synchronous>, transform_indices = @transform_3, window_bounds = array<i64: 16, 32>}, {pipeline_mode = #tpu.pipeline_mode<synchronous>, transform_indices = @transform_4, window_bounds = array<i64: 16, 1>}, {pipeline_mode = #tpu.pipeline_mode<synchronous>, transform_indices = @transform_5, window_bounds = array<i64: 16, 1>}, {transform_indices = @transform_6, window_bounds = array<i64: 1, 16, 200>}]} {
    %c0 = arith.constant 0 : index
    %c0_0 = arith.constant 0 : index
    %c0_1 = arith.constant 0 : index
    %0 = vector.load %arg2[%c0, %c0_0, %c0_1] : memref<1x16x200xf32, #tpu.memory_space<vmem>>, vector<1x16x200xf32>
    %1 = vector.shape_cast %0 : vector<1x16x200xf32> to vector<16x200xf32>
    %c0_2 = arith.constant 0 : index
    %c0_3 = arith.constant 0 : index
    %2 = vector.load %arg3[%c0_2, %c0_3] : memref<32x16xbf16, #tpu.memory_space<vmem>>, vector<32x16xbf16>
    %3 = arith.truncf %1 : vector<16x200xf32> to vector<16x200xbf16>
    %cst = arith.constant dense<0.000000e+00> : vector<32x200xf32>
    %4 = tpu.matmul %2, %3, %cst {dimension_numbers = #tpu.dot_dimension_numbers<[1], [0], [0], [1], [0, 0, 1, 1], [], []>} : vector<32x16xbf16>, vector<16x200xbf16>, vector<32x200xf32> -> vector<32x200xf32>
    %c0_4 = arith.constant 0 : index
    %c0_5 = arith.constant 0 : index
    %5 = vector.load %arg4[%c0_4, %c0_5] : memref<32x1xf32, #tpu.memory_space<vmem>>, vector<32x1xf32>
    %6 = vector.broadcast %5 : vector<32x1xf32> to vector<32x200xf32>
    %7 = arith.addf %4, %6 : vector<32x200xf32>
    %cst_6 = arith.constant 0.000000e+00 : f32
    %8 = vector.broadcast %cst_6 : f32 to vector<32x200xf32>
    %9 = arith.maximumf %7, %8 : vector<32x200xf32>
    %c0_7 = arith.constant 0 : index
    %c0_8 = arith.constant 0 : index
    %10 = vector.load %arg5[%c0_7, %c0_8] : memref<16x32xbf16, #tpu.memory_space<vmem>>, vector<16x32xbf16>
    %11 = arith.truncf %9 : vector<32x200xf32> to vector<32x200xbf16>
    %cst_9 = arith.constant dense<0.000000e+00> : vector<16x200xf32>
    %12 = tpu.matmul %10, %11, %cst_9 {dimension_numbers = #tpu.dot_dimension_numbers<[1], [0], [0], [1], [0, 0, 1, 1], [], []>} : vector<16x32xbf16>, vector<32x200xbf16>, vector<16x200xf32> -> vector<16x200xf32>
    %13 = arith.addf %1, %12 : vector<16x200xf32>
    %c0_10 = arith.constant 0 : index
    %c0_11 = arith.constant 0 : index
    %14 = vector.load %arg6[%c0_10, %c0_11] : memref<16x1xf32, #tpu.memory_space<vmem>>, vector<16x1xf32>
    %15 = vector.broadcast %14 : vector<16x1xf32> to vector<16x200xf32>
    %16 = arith.mulf %13, %15 : vector<16x200xf32>
    %c0_12 = arith.constant 0 : index
    %c0_13 = arith.constant 0 : index
    %17 = vector.load %arg7[%c0_12, %c0_13] : memref<16x1xf32, #tpu.memory_space<vmem>>, vector<16x1xf32>
    %18 = vector.broadcast %17 : vector<16x1xf32> to vector<16x200xf32>
    %19 = arith.addf %16, %18 : vector<16x200xf32>
    %c0_14 = arith.constant 0 : index
    %c0_15 = arith.constant 0 : index
    %c0_16 = arith.constant 0 : index
    %20 = vector.load %arg8[%c0_14, %c0_15, %c0_16] : memref<1x16x200xf32, #tpu.memory_space<vmem>>, vector<1x16x200xf32>
    %21 = vector.shape_cast %20 : vector<1x16x200xf32> to vector<16x200xf32>
    %22 = vector.shape_cast %19 : vector<16x200xf32> to vector<1x16x200xf32>
    tpu.vector_store %arg8[%c0_14, %c0_15, %c0_16], %22 {strides = array<i32>} : memref<1x16x200xf32, #tpu.memory_space<vmem>>, vector<1x16x200xf32>,
    return
  }
  func.func @transform_0(%arg0: i32, %arg1: i32) -> (i32, i32, i32) {
    %c0_i32 = arith.constant 0 : i32
    %c0_i32_0 = arith.constant 0 : i32
    return %arg0, %c0_i32, %arg1 : i32, i32, i32
  }
  func.func @transform_1(%arg0: i32, %arg1: i32) -> (i32, i32) {
    %c0_i32 = arith.constant 0 : i32
    %c0_i32_0 = arith.constant 0 : i32
    %c0_i32_1 = arith.constant 0 : i32
    return %c0_i32, %c0_i32_0 : i32, i32
  }
  func.func @transform_2(%arg0: i32, %arg1: i32) -> (i32, i32) {
    %c0_i32 = arith.constant 0 : i32
    %c0_i32_0 = arith.constant 0 : i32
    %c0_i32_1 = arith.constant 0 : i32
    return %c0_i32, %c0_i32_0 : i32, i32
  }
  func.func @transform_3(%arg0: i32, %arg1: i32) -> (i32, i32) {
    %c0_i32 = arith.constant 0 : i32
    %c0_i32_0 = arith.constant 0 : i32
    %c0_i32_1 = arith.constant 0 : i32
    return %c0_i32, %c0_i32_0 : i32, i32
  }
  func.func @transform_4(%arg0: i32, %arg1: i32) -> (i32, i32) {
    %c0_i32 = arith.constant 0 : i32
    %c0_i32_0 = arith.constant 0 : i32
    %c0_i32_1 = arith.constant 0 : i32
    return %c0_i32, %c0_i32_0 : i32, i32
  }
  func.func @transform_5(%arg0: i32, %arg1: i32) -> (i32, i32) {
    %c0_i32 = arith.constant 0 : i32
    %c0_i32_0 = arith.constant 0 : i32
    %c0_i32_1 = arith.constant 0 : i32
    return %c0_i32, %c0_i32_0 : i32, i32
  }
  func.func @transform_6(%arg0: i32, %arg1: i32) -> (i32, i32, i32) {
    %c0_i32 = arith.constant 0 : i32
    %c0_i32_0 = arith.constant 0 : i32
    return %arg0, %c0_i32, %arg1 : i32, i32, i32
  }
}

</mosaic_0001>

<bundles_post_ra>
// kernel: ff_forward.2
= control target key start
LH: loop header
LB: loop body
LE: loop exit
PB: predicated region body
PF: predicated region fallthrough
CT: control target
= control target key end

     0   :  { %s736_s18 = smov 0   ;;  %s738_s19 = smov 0   ;;  %s809_s0 = inlined_call_operand.vmem [shape: f32[2,16,200], index: 0, kind: input, shape index: {}]   ;;  %s810_s1 = inlined_call_operand.vmem [shape: bf16[32,16], index: 1, kind: input, shape index: {}]   ;;  %s811_s2 = inlined_call_operand.vmem [shape: f32[32,1], index: 2, kind: input, shape index: {}]   ;;  %s812_s3 = inlined_call_operand.vmem [shape: bf16[16,32], index: 3, kind: input, shape index: {}]   ;;  %s813_s4 = inlined_call_operand.vmem [shape: f32[2,1,16,1], index: 4, kind: output, shape index: {0}]   ;;  %s814_s5 = inlined_call_operand.vmem [shape: f32[2,1,16,1], index: 5, kind: output, shape index: {1}]  }
   0x1   :  { %s740_s20 = smov 0  }
   0x2 LB: > { %s28_s21 = sadd.s32 1, %s699_s19  ;;  %p633_p0 = scmp.ge.s32.totalorder %s703_s20, 1  ;;  %s703_s20 = sphi %s740_s20, %s16_s20   ;;  %s699_s19 = sphi %s738_s19, %s816_s19   ;;  %s695_s18 = sphi %s736_s18, %s815_s18  }
   0x3   : > { %p30_p1 = scmp.ge.s32.totalorder %s28_s21, 2  ;;  %p213_p2 = scmp.lt.s32.totalorder %s703_s20, 3 }
   0x5   : > { %s818_s21 = smov (%p30_p1, %s28_s21), 0  ;;  %p214_p3 = pnand %p633_p0, %p213_p2 }
   0x6   : > { %p259_p4 = scmp.lt.s32.totalorder (!%p214_p3), %s695_s18, 1 }
   0x7   : > { %217 = sbr.rel (%p214_p3) target bundleno = 591 (0x24f), region = 36 }
   0xc   : > { %v705_v0 = vmov 0   ;;  %s820_s18 = smov (!%p259_p4, %s695_s18), 1  ;;  %v297_v1 = vld [vmem:[%s811_s2] sm:$0xff]  ;;  %v299_v2 = vld [vmem:[%s811_s2 + $0x10] sm:$0xff]  ;;  %v298_v3 = vld [vmem:[%s811_s2 + $0x8] sm:$0xff]  ;;  %vm331_vm0 = vcmask 130048  }
   0xd   : > { %370 = vmatprep.mubr.bf16.mxu0 %v705_v0  ;;  %677 = vset.pattern.permute.xlu1 %v705_v0  ;;  %s648_s26 = sshll.u32 %s820_s18, 5  ;;  %v300_v4 = vld [vmem:[%s811_s2 + $0x18] sm:$0xff]  ;;  %v678_v11 = vld [vmem:[%s810_s1] sm:$0xff]   ;;  %v679_v12 = vld [vmem:[%s810_s1 + $0x8] sm:$0xff]   ;;  %vm410_vm1 = vcmask 261120   ;;  %vm461_vm2 = vcmask 588800  }
   0xe   : > { %676 = vset.pattern.permute.xlu0 %v705_v0  ;;  %446 = vmatprep.mubr.bf16.mxu1 %v705_v0  ;;  %s266_s6 = scalar_lea.vmem %s809_s0, %s648_s26  ;;  %v680_v45 = vld [vmem:[%s812_s3] sm:$0xff]   ;;  %s649_s15 = sshll.u32 %s820_s18, 4  ;;  %vm470_vm3 = vcmask 7168  }
   0xf   : > { %303 = vperm.xlu1 %677, %v297_v1   ;;  %313 = vperm.xlu0 %676, %v299_v2   ;;  %v288_v5 = vld [vmem:[%s266_s6 + $0x8] sm:$0xff]  ;;  %v772_v6 = vld [vmem:[%s266_s6 + $0x18] sm:$0xff]  ;;  %v287_v7 = vld [vmem:[%s266_s6] sm:$0xff]  ;;  %s276_s22 = scalar_lea.vmem %s813_s4, %s649_s15  ;;  %s285_s25 = scalar_lea.vmem %s814_s5, %s649_s15 }
  0x10   : > { %v296_v8 = vpack.c.bf16 %v772_v6, %v288_v5  ;;  %v775_v9 = vld [vmem:[%s266_s6 + $0x10] sm:$0xff] }
  0x11   : > { %v295_v10 = vpack.c.bf16 %v775_v9, %v287_v7 }
  0x12   : > { %352 = vmatprep.subr.bf16.mxu0 %v296_v8 }
  0x13   : > { %308 = vperm.xlu1 %677, %v298_v3   ;;  %318 = vperm.xlu0 %676, %v300_v4  }
  0x14   : > { %353 = vmatpush1.bf16.msra.mxu0 %v295_v10 }
  0x17   : > { %642 = vmatmul.mubr.msk.bf16.vlgmr.msra.gmra.mxu0 %vm331_vm0, %v678_v11 }
  0x18   : > { %380 = vmatprep.mubr.bf16.mxu0 %v705_v0 }
  0x1f   : > { %643 = vmatmul.mubr.msk.bf16.gmra.mxu0 %vm331_vm0, %v679_v12 }
  0x8a   : > { %v304_v16 = vpop.permute.xlu1 %303  ;;  %v314_v17 = vpop.permute.xlu0 %313 }
  0x8e   : > { %v309_v21 = vpop.permute.xlu1 %308  ;;  %v319_v22 = vpop.permute.xlu0 %318 }
  0xd7   : > { %v372_v13 = vpop.f32.mrf.mxu0 }
  0xd8   : > { %v373_v36 = vadd.f32 %v372_v13, %v304_v16 }
  0xd9   : > { %v374_v14 = vpop.f32.mrf.mxu0 }
  0xda   : > { %v375_v29 = vadd.f32 %v374_v14, %v304_v16  ;;  %v391_v43 = vmax.f32 %v373_v36, 0.0 }
  0xdb   : > { %v376_v15 = vpop.f32.mrf.mxu0 }
  0xdc   : > { %v377_v31 = vadd.f32 %v376_v15, %v309_v21  ;;  %v392_v38 = vmax.f32 %v375_v29, 0.0 }
  0xdd   : > { %v378_v18 = vpop.f32.mrf.mxu0 }
  0xde   : > { %v379_v24 = vadd.f32 %v378_v18, %v309_v21  ;;  %v393_v40 = vmax.f32 %v377_v31, 0.0 }
  0xdf   : > { %v382_v19 = vpop.f32.mrf.mxu0 }
  0xe0   : > { %v383_v27 = vadd.f32 %v382_v19, %v314_v17  ;;  %v394_v33 = vmax.f32 %v379_v24, 0.0  ;;  %v401_v44 = vpack.c.bf16 %v393_v40, %v391_v43 }
  0xe1   : > { %v384_v20 = vpop.f32.mrf.mxu0 }
  0xe2   : > { %v385_v25 = vadd.f32 %v384_v20, %v314_v17  ;;  %v395_v37 = vmax.f32 %v383_v27, 0.0  ;;  %v402_v42 = vpack.c.bf16 %v394_v33, %v392_v38 }
  0xe3   : > { %v386_v23 = vpop.f32.mrf.mxu0 }
  0xe4   : > { %v387_v26 = vadd.f32 %v386_v23, %v319_v22  ;;  %v396_v34 = vmax.f32 %v385_v25, 0.0 }
  0xe5   : > { %v388_v28 = vpop.f32.mrf.mxu0 }
  0xe6   : > { %v389_v30 = vadd.f32 %v388_v28, %v319_v22  ;;  %v397_v32 = vmax.f32 %v387_v26, 0.0 }
  0xe8   : > { %v398_v35 = vmax.f32 %v389_v30, 0.0  ;;  %v403_v41 = vpack.c.bf16 %v397_v32, %v395_v37 }
  0xea   : > { %v404_v39 = vpack.c.bf16 %v398_v35, %v396_v34 }
  0xec   : > { %426 = vmatprep.subr.bf16.mxu1 %v404_v39 }
  0xed   : > { %427 = vmatpush1.bf16.msra.mxu1 %v403_v41 }
  0xee   : > { %428 = vmatprep.subr.bf16.mxu1 %v402_v42 }
  0xf1   : > { %429 = vmatpush1.bf16.msra.mxu1 %v401_v44 }
  0xf4   : > { %645 = vmatmul.mubr.msk.bf16.vlgmr.msra.gmra.mxu1 %vm410_vm1, %v680_v45 }
 0x1b4   : > { %v448_v46 = vpop.f32.mrf.mxu1 }
 0x1b5   : > { %v457_v49 = vadd.f32 %v448_v46, %v287_v7 }
 0x1b6   : > { %v450_v47 = vpop.f32.mrf.mxu1 }
 0x1b7   : > { %v458_v48 = vadd.f32 %v450_v47, %v288_v5  ;;  %v473_v57 = vmul.f32 %v457_v49, %v457_v49 }
 0x1b8   : > { %v452_v50 = vpop.f32.mrf.mxu1 }
 0x1b9   : > { %v474_v51 = vmul.f32 %v458_v48, %v458_v48  ;;  %v462_v52 = vsel %vm461_vm2, %v458_v48, 0.0  ;;  %v459_v58 = vadd.f32 %v452_v50, %v775_v9 }
 0x1ba   : > { %v454_v53 = vpop.f32.mrf.mxu1  ;;  %v463_v54 = vadd.f32 %v462_v52, %v457_v49 }
 0x1bb   : > { %v460_v55 = vadd.f32 %v454_v53, %v772_v6  ;;  %v477_v56 = vsel %vm461_vm2, %v474_v51, 0.0  ;;  %v475_v0 = vmul.f32 %v459_v58, %v459_v58 }
 0x1bc   : > { %464 = vadd.xlane.f32.xlu0 %v463_v54  ;;  %v478_v61 = vadd.f32 %v477_v56, %v473_v57 }
 0x1bd   : > { %v476_v59 = vmul.f32 %v460_v55, %v460_v55  ;;  %v466_v60 = vsel %vm461_vm2, %v460_v55, 0.0 }
 0x1be   : > { %v467_v62 = vadd.f32 %v466_v60, %v459_v58 }
 0x1bf   : > { %v481_v63 = vsel %vm461_vm2, %v476_v59, 0.0 }
 0x1c0   : > { %479 = vadd.xlane.f32.xlu0 %v478_v61  ;;  %468 = vadd.xlane.f32.xlu1 %v467_v62  ;;  %v482_v1 = vadd.f32 %v481_v63, %v475_v0 }
 0x1c4   : > { %483 = vadd.xlane.f32.xlu0 %v482_v1 }
 0x245   : > { %v465_v2 = vpop.xlane.xlu0 %464 }
 0x246   : > { %471 = vst.msk [vmem:[%s276_s22] sm:$0xff] %vm470_vm3, %v465_v2 }
 0x249   : > { %v480_v3 = vpop.xlane.xlu0 %479  ;;  %v469_v4 = vpop.xlane.xlu1 %468 }
 0x24a   : > { %485 = vst.msk [vmem:[%s285_s25] sm:$0xff] %vm470_vm3, %v480_v3  ;;  %472 = vst.msk [vmem:[%s276_s22 + $0x8] sm:$0xff] %vm470_vm3, %v469_v4 }
 0x24d   : > { %v484_v5 = vpop.xlane.xlu0 %483 }
 0x24e   : > { %486 = vst.msk [vmem:[%s285_s25 + $0x8] sm:$0xff] %vm470_vm3, %v484_v5 }
 0x24f PF: > { %s16_s20 = sadd.s32 1, %s703_s20   ;;  %s815_s18 = smov %s699_s19 }
 0x250   : > { %p13_p5 = scmp.ge.s32.totalorder %s16_s20, 4   ;;  %s816_s19 = smov %s818_s21 }
 0x252   :  { %15 = sbr.rel (!%p13_p5) target bundleno = 2 (0x2), region = 78 }

// kernel: ff_forward.3
= control target key start
LH: loop header
LB: loop body
LE: loop exit
PB: predicated region body
PF: predicated region fallthrough
CT: control target
= control target key end

     0   :  { %11 = vsyncpa [#allocation3], 0  ;;  %s958_s0 = inlined_call_operand.vmem [shape: f32[2,16,200], index: 0, kind: input, shape index: {}]   ;;  %s959_s1 = inlined_call_operand.vmem [shape: bf16[32,16], index: 1, kind: input, shape index: {}]   ;;  %s960_s2 = inlined_call_operand.vmem [shape: f32[32,1], index: 2, kind: input, shape index: {}]   ;;  %s961_s3 = inlined_call_operand.vmem [shape: bf16[16,32], index: 3, kind: input, shape index: {}]   ;;  %s962_s4 = inlined_call_operand.vmem [shape: f32[16,1], index: 4, kind: input, shape index: {}]   ;;  %s963_s5 = inlined_call_operand.vmem [shape: f32[16,1], index: 5, kind: input, shape index: {}]   ;;  %s964_s6 = inlined_call_operand.hbm [shape: f32[2,16,200], index: 6, kind: output, shape index: {}]  }
   0x1   :  { %13 = vsyncpa [#allocation3 + $0x1], 0  ;;  %s789_s21 = smov 0   ;;  %s791_s22 = smov 0  }
   0x2   :  { %s793_s23 = smov 0   ;;  %s795_s24 = smov 0  }
   0x3   :  { %s797_s25 = smov 0   ;;  %s799_s26 = smov 0  }
   0x4 LB: > { %s588_s27 = sadd.s32 4294967295, %s748_s26   ;;  %s589_s28 = sadd.s32 4294967294, %s748_s26   ;;  %s748_s26 = sphi %s799_s26, %s19_s26   ;;  %s744_s25 = sphi %s797_s25, %s971_s25   ;;  %s740_s24 = sphi %s795_s24, %s970_s24   ;;  %s736_s23 = sphi %s793_s23, %s969_s23   ;;  %s732_s22 = sphi %s791_s22, %s968_s22   ;;  %s728_s21 = sphi %s789_s21, %s967_s21  }
   0x5   : > { %s31_s29 = sadd.s32 1, %s744_s25  ;;  %s173_s30 = sadd.s32 1, %s736_s23 }
   0x6   : > { %p33_p0 = scmp.ge.s32.totalorder %s31_s29, 2  ;;  %p183_p1 = scmp.ne.s32.totalorder %s736_s23, %s732_s22 }
   0x7   : > { %p184_p2 = scmp.eq.s32.totalorder %s588_s27, 1  ;;  %p189_p3 = scmp.ne.s32.totalorder %s732_s22, %s728_s21 }
   0x8   : > { %s973_s29 = smov (%p33_p0, %s31_s29), 0  ;;  %p190_p5 = scmp.eq.s32.totalorder %s589_s28, 1 }
   0x9   : > { %p829_p4 = por %p184_p2, %p183_p1  ;;  %s168_s8 = ssub.s32 %s744_s25, %s973_s29 }
   0xa   : > { %p592_p6 = scmp.ge.s32.totalorder %s748_s26, 1  ;;  %p171_p7 = scmp.eq.s32.totalorder %s168_s8, 0 }
   0xb   : > { %p836_p8 = por %p190_p5, %p189_p3  ;;  %p236_p9 = scmp.lt.s32.totalorder %s748_s26, 3 }
   0xc   : > { %s842_s10 = scalar_select %p171_p7, %s736_s23, %s173_s30  }
   0xd   : > { %p237_p10 = pnand %p592_p6, %p236_p9 }
   0xe   : > { %p271_p11 = scmp.lt.s32.totalorder (!%p237_p10), %s740_s24, 1  ;;  %s267_s8 = sand.u32 (!%p237_p10), 1, %s732_s22  }
   0xf   : > { %240 = sbr.rel (%p237_p10) target bundleno = 472 (0x1d8), region = 44  ;;  %s608_s14 = sshll.u32 (!%p237_p10), %s740_s24, 9 }
  0x10   : > { %s908_s17 = scalar_lea.hbm (!%p237_p10), %s964_s6, %s608_s14  ;;  %s751_s19 = smov (!%p237_p10), [#allocation2]  }
  0x11   : > { %s676_s20 = sshll.u32 (!%p237_p10), %s751_s19, 4  ;;  %s677_s20 = int_to_ptr.vmem [resolvable:$false] %s676_s20 }
  0x12   : > { %s678_s27 = scalar_lea.vmem (!%p237_p10), %s677_s20, 1024 }
  0x14   : > { %v750_v0 = vmov 0   ;;  %s272_s11 = scalar_select %p271_p11, %s740_s24, 1  ;;  %v294_v1 = vld [vmem:[%s960_s2 + $0x10] sm:$0xff]  ;;  %v292_v2 = vld [vmem:[%s960_s2] sm:$0xff]  ;;  %v295_v3 = vld [vmem:[%s960_s2 + $0x18] sm:$0xff]  ;;  %vm326_vm0 = vcmask 130048  }
  0x15   : > { %365 = vmatprep.mubr.bf16.mxu0 %v750_v0  ;;  %667 = vset.pattern.permute.xlu0 %v750_v0  ;;  %v293_v4 = vld [vmem:[%s960_s2 + $0x8] sm:$0xff]  ;;  %v456_v11 = vld [vmem:[%s962_s4] sm:$0xff]  ;;  %vm405_vm1 = vcmask 261120   ;;  %vm489_vm2 = vcmask 588800   ;;  %s913_s24 = scalar_lea.sflag [#allocation3], %s267_s8 }
  0x16   : > { %668 = vset.pattern.permute.xlu1 %v750_v0  ;;  %441 = vmatprep.mubr.bf16.mxu1 %v750_v0  ;;  %s607_s16 = sshll.u32 %s272_s11, 5  ;;  %v457_v12 = vld [vmem:[%s962_s4 + $0x8] sm:$0xff]  ;;  %v669_v13 = vld [vmem:[%s959_s1] sm:$0xff]   ;;  %s593_s11 = sshll.u32 %s267_s8, 5 }
  0x17   : > { %308 = vperm.xlu0 %667, %v294_v1   ;;  %298 = vperm.xlu1 %668, %v292_v2   ;;  %s278_s30 = scalar_lea.vmem %s958_s0, %s607_s16  ;;  %v472_v14 = vld [vmem:[%s963_s5] sm:$0xff]  ;;  %v473_v15 = vld [vmem:[%s963_s5 + $0x8] sm:$0xff]  ;;  %s269_s12 = scalar_lea.vmem [#allocation2], %s593_s11 }
  0x18   : > { %v861_v5 = vld [vmem:[%s278_s30 + $0x8] sm:$0xff]  ;;  %v863_v6 = vld [vmem:[%s278_s30 + $0x18] sm:$0xff]  ;;  %v865_v7 = vld [vmem:[%s278_s30] sm:$0xff]  ;;  %s509_s13 = sshll.u32 %s269_s12, 4  ;;  %s903_s13 = int_to_ptr.vmem [resolvable:$true] %s509_s13 }
  0x19   : > { %v291_v8 = vpack.c.bf16 %v863_v6, %v861_v5  ;;  %v869_v9 = vld [vmem:[%s278_s30 + $0x10] sm:$0xff]  ;;  %v670_v16 = vld [vmem:[%s959_s1 + $0x8] sm:$0xff]   ;;  %v671_v49 = vld [vmem:[%s961_s3] sm:$0xff]   ;;  %s672_s18 = scalar_lea.vmem %s903_s13, 512  ;;  %p679_p1 = scmp.lt.s32.totalorder %s903_s13, %s677_s20 }
  0x1a   : > { %v290_v10 = vpack.c.bf16 %v869_v9, %v865_v7  ;;  %p673_p12 = scmp.ne.s32.totalorder %s903_s13, %s672_s18  ;;  %p680_p2 = scmp.lt.s32.totalorder %s678_s27, %s672_s18 }
  0x1b   : > { %313 = vperm.xlu0 %667, %v295_v3   ;;  %303 = vperm.xlu1 %668, %v293_v4  }
  0x1c   : > { %347 = vmatprep.subr.bf16.mxu0 %v291_v8  ;;  %p674_p13 = pnand %p673_p12, %p829_p4  ;;  %p681_p3 = por %p680_p2, %p679_p1 }
  0x1d   : > { %348 = vmatpush1.bf16.msra.mxu0 %v290_v10 }
  0x1e   : > { %p675_p0 = pneg %p674_p13 }
  0x1f   : > { %460 = vperm.xlu0 %667, %v456_v11   ;;  %465 = vperm.xlu1 %668, %v457_v12  }
  0x20   : > { %598 = vmatmul.mubr.msk.bf16.vlgmr.msra.gmra.mxu0 %vm326_vm0, %v669_v13  ;;  %p682_p5 = pnand %p681_p3, %p675_p0 }
  0x21   : > { %375 = vmatprep.mubr.bf16.mxu0 %v750_v0 }
  0x23   : > { %476 = vperm.xlu0 %667, %v472_v14   ;;  %481 = vperm.xlu1 %668, %v473_v15  }
  0x28   : > { %599 = vmatmul.mubr.msk.bf16.gmra.mxu0 %vm326_vm0, %v670_v16 }
  0x92   : > { %v309_v20 = vpop.permute.xlu0 %308  ;;  %v299_v21 = vpop.permute.xlu1 %298 }
  0x96   : > { %v314_v25 = vpop.permute.xlu0 %313  ;;  %v304_v26 = vpop.permute.xlu1 %303 }
  0x9a   : > { %v461_v50 = vpop.permute.xlu0 %460  ;;  %v466_v53 = vpop.permute.xlu1 %465 }
  0x9e   : > { %v477_v57 = vpop.permute.xlu0 %476  ;;  %v482_v2 = vpop.permute.xlu1 %481 }
  0xe0   : > { %v367_v17 = vpop.f32.mrf.mxu0 }
  0xe1   : > { %v368_v40 = vadd.f32 %v367_v17, %v299_v21 }
  0xe2   : > { %v369_v18 = vpop.f32.mrf.mxu0 }
  0xe3   : > { %v370_v33 = vadd.f32 %v369_v18, %v299_v21  ;;  %v386_v47 = vmax.f32 %v368_v40, 0.0 }
  0xe4   : > { %v371_v19 = vpop.f32.mrf.mxu0 }
  0xe5   : > { %v372_v35 = vadd.f32 %v371_v19, %v304_v26  ;;  %v387_v42 = vmax.f32 %v370_v33, 0.0 }
  0xe6   : > { %v373_v22 = vpop.f32.mrf.mxu0 }
  0xe7   : > { %v374_v28 = vadd.f32 %v373_v22, %v304_v26  ;;  %v388_v44 = vmax.f32 %v372_v35, 0.0 }
  0xe8   : > { %v377_v23 = vpop.f32.mrf.mxu0 }
  0xe9   : > { %v378_v31 = vadd.f32 %v377_v23, %v309_v20  ;;  %v389_v37 = vmax.f32 %v374_v28, 0.0  ;;  %v396_v48 = vpack.c.bf16 %v388_v44, %v386_v47 }
  0xea   : > { %v379_v24 = vpop.f32.mrf.mxu0 }
  0xeb   : > { %v380_v29 = vadd.f32 %v379_v24, %v309_v20  ;;  %v390_v41 = vmax.f32 %v378_v31, 0.0  ;;  %v397_v46 = vpack.c.bf16 %v389_v37, %v387_v42 }
  0xec   : > { %v381_v27 = vpop.f32.mrf.mxu0 }
  0xed   : > { %v382_v30 = vadd.f32 %v381_v27, %v314_v25  ;;  %v391_v38 = vmax.f32 %v380_v29, 0.0 }
  0xee   : > { %v383_v32 = vpop.f32.mrf.mxu0 }
  0xef   : > { %v384_v34 = vadd.f32 %v383_v32, %v314_v25  ;;  %v392_v36 = vmax.f32 %v382_v30, 0.0 }
  0xf1   : > { %v393_v39 = vmax.f32 %v384_v34, 0.0  ;;  %v398_v45 = vpack.c.bf16 %v392_v36, %v390_v41 }
  0xf3   : > { %v399_v43 = vpack.c.bf16 %v393_v39, %v391_v38 }
  0xf5   : > { %421 = vmatprep.subr.bf16.mxu1 %v399_v43 }
  0xf6   : > { %422 = vmatpush1.bf16.msra.mxu1 %v398_v45 }
  0xf7   : > { %423 = vmatprep.subr.bf16.mxu1 %v397_v46 }
  0xfa   : > { %424 = vmatpush1.bf16.msra.mxu1 %v396_v48 }
  0xfd   : > { %601 = vmatmul.mubr.msk.bf16.vlgmr.msra.gmra.mxu1 %vm405_vm1, %v671_v49 }
 0x1bd   : > { %v443_v51 = vpop.f32.mrf.mxu1 }
 0x1be   : > { %v452_v52 = vadd.f32 %v443_v51, %v865_v7 }
 0x1bf   : > { %v445_v54 = vpop.f32.mrf.mxu1 }
 0x1c0   : > { %v468_v55 = vmul.f32 %v461_v50, %v452_v52  ;;  %v453_v56 = vadd.f32 %v445_v54, %v861_v5 }
 0x1c1   : > { %v447_v58 = vpop.f32.mrf.mxu1 }
 0x1c2   : > { %v484_v59 = vadd.f32 %v477_v57, %v468_v55  ;;  %v469_v60 = vmul.f32 %v461_v50, %v453_v56  ;;  %v454_v61 = vadd.f32 %v447_v58, %v869_v9 }
 0x1c3   : > { %v449_v62 = vpop.f32.mrf.mxu1 }
 0x1c4   : > { %488 = vst [vmem:[%s269_s12] sm:$0xff] %v484_v59  ;;  %v485_v63 = vadd.f32 %v477_v57, %v469_v60  ;;  %v470_v0 = vmul.f32 %v466_v53, %v454_v61  ;;  %v455_v1 = vadd.f32 %v449_v62, %v863_v6 }
 0x1c6   : > { %490 = vst.msk [vmem:[%s269_s12 + $0x8] sm:$0xff] %vm489_vm2, %v485_v63  ;;  %v486_v3 = vadd.f32 %v482_v2, %v470_v0  ;;  %v471_v4 = vmul.f32 %v466_v53, %v455_v1 }
 0x1c8   : > { %491 = vst [vmem:[%s269_s12 + $0x10] sm:$0xff] %v486_v3  ;;  %v487_v5 = vadd.f32 %v482_v2, %v471_v4 }
 0x1ca   : > { %492 = vst.msk [vmem:[%s269_s12 + $0x18] sm:$0xff] %vm489_vm2, %v487_v5 }
 0x1cb   : > { %685 = shalt.err (!%p682_p5)
}
 0x1cc   : > { %s686_s28 = scalar_lea.hbm %s908_s17, 512  ;;  %s690_s11 = scalar_lea.hbm %s964_s6, 1024 }
 0x1cd   : > { %p687_p6 = scmp.ne.s32.totalorder %s908_s17, %s686_s28  ;;  %p691_p10 = scmp.lt.s32.totalorder %s908_s17, %s964_s6 }
 0x1ce   : > { %p692_p11 = scmp.lt.s32.totalorder %s690_s11, %s686_s28 }
 0x1cf   : > { %p688_p7 = pnand %p687_p6, %p829_p4 }
 0x1d0   : > { %p693_p12 = por %p692_p11, %p691_p10 }
 0x1d1   : > { %p689_p9 = pneg %p688_p7 }
 0x1d3   : > { %p694_p13 = pnand %p693_p12, %p689_p9 }
 0x1d5   : > { %697 = shalt.err (!%p694_p13)
}
 0x1d6   : > { %s752_s15 = smov 256   ;;  %s753_s16 = smov 16  }
 0x1d7   : > { %609 = dma.vmem_to_hbm [thread:$0]  (%p829_p4), %s903_s13, 512, %s908_s17, %s913_s24, %s752_s15, %s752_s15, %s753_s16  }
 0x1d8 PF: > { %p615_p0 = scmp.ge.s32.totalorder %s748_s26, 2  ;;  %s524_s18 = sand.u32 1, %s728_s21  }
 0x1d9   : > { %s525_s19 = scalar_lea.sflag [#allocation3], %s524_s18 }
 0x1da   : > { %p612_p1 = pnand %p615_p0, %p836_p8 }
 0x1dc   : > { %p613_p2 = pneg %p612_p1 }
 0x1de   : > { %723 = dma.done.wait (%p613_p2), %s525_s19, 512  }
 0x1df   : > { %725 = vsyncadd (%p613_p2), %s525_s19, 4294966784  ;;  %s19_s26 = sadd.s32 1, %s748_s26   ;;  %s967_s21 = smov %s732_s22 }
 0x1e0   : > { %p16_p3 = scmp.ge.s32.totalorder %s19_s26, 4   ;;  %s968_s22 = smov %s736_s23 }
 0x1e1   : > { %s969_s23 = smov %s842_s10  ;;  %s970_s24 = smov %s744_s25 }
 0x1e2   : > { %s971_s25 = smov %s973_s29  ;;  %18 = sbr.rel (!%p16_p3) target bundleno = 4 (0x4), region = 79 }
 0x1e7   :  { %530 = vsyncpa [#allocation3], 1 }
 0x1e8   :  { %532 = vsyncpa [#allocation3 + $0x1], 1 }

</bundles_post_ra>
